<compile_context>
chip_gen: v6e
topology: v6e:2x2x1
jax: 0.10.0
libtpu: 0.0.40
codegen_flags: <defaults>
</compile_context>

<pallas_src>
import jax
import jax.numpy as jnp
from jax.experimental import pallas as pl
from jax.experimental.pallas import tpu as pltpu


def gated_mlp_kernel(x_ref, wg_ref, wu_ref, bg_ref, bu_ref, w2_ref, b2_ref,
                     o_ref, acc_ref):
    # x_ref : (tm, fan_in)    token tile, resident across the fan_h axis
    # wg_ref: (fan_in, th)    fc1 gate-half weight tile
    # wu_ref: (fan_in, th)    fc1 up-half weight tile
    # bg_ref: (1, th)         fc1 gate-half bias tile
    # bu_ref: (1, th)         fc1 up-half bias tile
    # w2_ref: (th, fan_out)   fc2 weight tile (K dim tiled with fan_h)
    # b2_ref: (1, fan_out)    fc2 bias (folded into accumulator init)
    # o_ref : (tm, fan_out)   output tile (written on last fan_h block)
    # acc_ref: VMEM (tm, fan_out) f32 accumulator
    k = pl.program_id(1)

    @pl.when(k == 0)
    def _():
        # Fold the fc2 bias into the accumulator init (saves a full-width
        # VPU add pass over (tm, fan_out) at the end).
        acc_ref[...] = jnp.broadcast_to(
            b2_ref[...].astype(jnp.float32), acc_ref.shape)

    x = x_ref[...]  # native dtype -> MXU at full rate (bf16 path on v6e/v7x)

    # fc1 gate / up halves: two MXU dots, f32 accumulation.
    g = jnp.dot(x, wg_ref[...], preferred_element_type=jnp.float32)
    u = jnp.dot(x, wu_ref[...], preferred_element_type=jnp.float32)
    g = g + bg_ref[...].astype(jnp.float32)
    u = u + bu_ref[...].astype(jnp.float32)

    # Gated activation silu(g) * u in f32 (sigmoid on EUP, muls on VPU).
    gated = (g * jax.nn.sigmoid(g)) * u

    # fc2 partial product for this fan_h tile; cast back to the weight dtype
    # so the MXU runs at full rate, accumulate in f32.
    acc_ref[...] += jnp.dot(gated.astype(w2_ref.dtype), w2_ref[...],
                            preferred_element_type=jnp.float32)

    @pl.when(k == pl.num_programs(1) - 1)
    def _():
        o_ref[...] = acc_ref[...].astype(o_ref.dtype)


def _pick_tile(dim, candidates):
    for c in candidates:
        if dim % c == 0:
            return c
    return dim


def gated_mlp(x, w1, b1, w2, b2, *, tm=None, th=None):
    """x: [..., fan_in]; w1: [fan_in, 2*fan_h]; b1: [2*fan_h];
    w2: [fan_h, fan_out]; b2: [fan_out]. Weights pre-transposed ([in, out])."""
    orig_shape = x.shape
    fan_in = orig_shape[-1]
    fan_h, fan_out = w2.shape
    assert w1.shape == (fan_in, 2 * fan_h)

    xm = x.reshape(-1, fan_in)
    M = xm.shape[0]

    # Row tile: real tile (pipelining + megacore sharding) instead of tm = M.
    if tm is None:
        tm = M if M <= 256 else 256
    tm = min(tm, M)
    if tm < M:
        assert tm % 8 == 0, "row tile must be a multiple of 8 sublanes"

    # fan_h tile (N of fc1 == K of fc2): prefer 512/256-aligned for the MXU.
    if th is None:
        th = _pick_tile(fan_h, (512, 256, 128))

    # Split W1/b1 into gate & up halves in the wrapper (one-time, outside kernel).
    wg = w1[:, :fan_h]
    wu = w1[:, fan_h:]
    bg = b1[:fan_h].reshape(1, fan_h)
    bu = b1[fan_h:].reshape(1, fan_h)
    b2_2d = b2.reshape(1, fan_out)

    grid = (pl.cdiv(M, tm), pl.cdiv(fan_h, th))

    itemsize = jnp.dtype(x.dtype).itemsize
    cost = pl.CostEstimate(
        flops=2 * M * fan_in * (2 * fan_h) + 2 * M * fan_h * fan_out,
        transcendentals=M * fan_h,
        bytes_accessed=(xm.size + w1.size + b1.size + w2.size + b2.size
                        + M * fan_out) * itemsize,
    )

    out = pl.pallas_call(
        gated_mlp_kernel,
        out_shape=jax.ShapeDtypeStruct((M, fan_out), x.dtype),
        grid_spec=pltpu.PrefetchScalarGridSpec(
            num_scalar_prefetch=0,
            grid=grid,
            in_specs=[
                pl.BlockSpec((tm, fan_in), lambda i, k: (i, 0)),   # x tile (k-invariant)
                pl.BlockSpec((fan_in, th), lambda i, k: (0, k)),   # W1 gate half
                pl.BlockSpec((fan_in, th), lambda i, k: (0, k)),   # W1 up half
                pl.BlockSpec((1, th), lambda i, k: (0, k)),        # b1 gate half
                pl.BlockSpec((1, th), lambda i, k: (0, k)),        # b1 up half
                pl.BlockSpec((th, fan_out), lambda i, k: (k, 0)),  # W2 tile
                pl.BlockSpec((1, fan_out), lambda i, k: (0, 0)),   # b2
            ],
            out_specs=pl.BlockSpec((tm, fan_out), lambda i, k: (i, 0)),
            scratch_shapes=[pltpu.VMEM((tm, fan_out), jnp.float32)],
        ),
        compiler_params=pltpu.CompilerParams(
            dimension_semantics=("parallel", "arbitrary"),
        ),
        cost_estimate=cost,
    )(xm, wg, wu, bg, bu, w2, b2_2d)

    return out.reshape(*orig_shape[:-1], fan_out)


def _reference(x, w1, b1, w2, b2):
    h = jnp.dot(x, w1) + b1
    fan_h = w2.shape[0]
    g, u = h[..., :fan_h], h[..., fan_h:]
    gated = jax.nn.silu(g) * u
    return jnp.dot(gated, w2) + b2


if __name__ == "__main__":
    key = jax.random.PRNGKey(0)

    # ---- Test 1: toy shapes consistent with the module (single-block path) ----
    batch, seq = 2, 8
    fan_in, fan_h, fan_out = 32, 64, 32
    kx, k1, kb1, k2, kb2, key = jax.random.split(key, 6)

    x = jax.random.normal(kx, (batch, seq, fan_in), dtype=jnp.float32)
    w1 = jax.random.normal(k1, (fan_in, 2 * fan_h), dtype=jnp.float32) * 0.05
    b1 = jax.random.normal(kb1, (2 * fan_h,), dtype=jnp.float32) * 0.05
    w2 = jax.random.normal(k2, (fan_h, fan_out), dtype=jnp.float32) * 0.05
    b2 = jax.random.normal(kb2, (fan_out,), dtype=jnp.float32) * 0.05

    out = jax.block_until_ready(gated_mlp(x, w1, b1, w2, b2))
    ref = _reference(x, w1, b1, w2, b2)
    assert out.shape == (batch, seq, fan_out)
    assert jnp.allclose(out, ref, atol=1e-4, rtol=1e-4), "test1 mismatch vs reference"

    # ---- Test 2: exercises row tiling + fan_h accumulation (2x2 grid) ----
    batch2, seq2 = 2, 16
    fi2, fh2, fo2 = 32, 256, 128
    kx2, k12, kb12, k22, kb22 = jax.random.split(key, 5)

    x2 = jax.random.normal(kx2, (batch2, seq2, fi2), dtype=jnp.float32)
    w1_2 = jax.random.normal(k12, (fi2, 2 * fh2), dtype=jnp.float32) * 0.05
    b1_2 = jax.random.normal(kb12, (2 * fh2,), dtype=jnp.float32) * 0.05
    w2_2 = jax.random.normal(k22, (fh2, fo2), dtype=jnp.float32) * 0.05
    b2_2 = jax.random.normal(kb22, (fo2,), dtype=jnp.float32) * 0.05

    out2 = jax.block_until_ready(gated_mlp(x2, w1_2, b1_2, w2_2, b2_2, tm=16, th=128))
    ref2 = _reference(x2, w1_2, b1_2, w2_2, b2_2)
    assert out2.shape == (batch2, seq2, fo2)
    assert jnp.allclose(out2, ref2, atol=1e-3, rtol=1e-3), "test2 mismatch vs reference"

    print("KERNEL_OK")
</pallas_src>

<mosaic_0001>
module attributes {stable_mosaic.version = 11 : i64} {
  func.func @gated_mlp_kernel(%arg0: i32, %arg1: i32, %arg2: memref<16x32xf32, #tpu.memory_space<vmem>>, %arg3: memref<32x64xf32, #tpu.memory_space<vmem>>, %arg4: memref<32x64xf32, #tpu.memory_space<vmem>>, %arg5: memref<1x64xf32, #tpu.memory_space<vmem>>, %arg6: memref<1x64xf32, #tpu.memory_space<vmem>>, %arg7: memref<64x32xf32, #tpu.memory_space<vmem>>, %arg8: memref<1x32xf32, #tpu.memory_space<vmem>>, %arg9: memref<16x32xf32, #tpu.memory_space<vmem>>, %arg10: memref<16x32xf32, #tpu.memory_space<vmem>>) attributes {dimension_semantics = [#tpu.dimension_semantics<parallel>, #tpu.dimension_semantics<arbitrary>], iteration_bounds = array<i64: 1, 1>, scalar_prefetch = 0 : i64, scratch_operands = 1 : i64, tpu.core_type = #tpu.core_type<tc>, window_params = [{transform_indices = @transform_0, window_bounds = array<i64: 16, 32>}, {transform_indices = @transform_1, window_bounds = array<i64: 32, 64>}, {transform_indices = @transform_2, window_bounds = array<i64: 32, 64>}, {transform_indices = @transform_3, window_bounds = array<i64: 1, 64>}, {transform_indices = @transform_4, window_bounds = array<i64: 1, 64>}, {transform_indices = @transform_5, window_bounds = array<i64: 64, 32>}, {pipeline_mode = #tpu.pipeline_mode<synchronous>, transform_indices = @transform_6, window_bounds = array<i64: 1, 32>}, {transform_indices = @transform_7, window_bounds = array<i64: 16, 32>}]} {
    %c0_i32 = arith.constant 0 : i32
    %0 = arith.cmpi eq, %arg1, %c0_i32 : i32
    %1 = arith.extui %0 : i1 to i32
    %c0_i32_0 = arith.constant 0 : i32
    %2 = arith.cmpi ne, %1, %c0_i32_0 : i32
    scf.if %2 {
      %c0_21 = arith.constant 0 : index
      %c0_22 = arith.constant 0 : index
      %29 = vector.load %arg8[%c0_21, %c0_22] : memref<1x32xf32, #tpu.memory_space<vmem>>, vector<1x32xf32>
      %30 = vector.shape_cast %29 : vector<1x32xf32> to vector<1x32xf32>
      %31 = vector.broadcast %30 : vector<1x32xf32> to vector<16x32xf32>
      %c0_23 = arith.constant 0 : index
      %c0_24 = arith.constant 0 : index
      %32 = vector.load %arg10[%c0_23, %c0_24] : memref<16x32xf32, #tpu.memory_space<vmem>>, vector<16x32xf32>
      tpu.vector_store %arg10[%c0_23, %c0_24], %31 {strides = array<i32>} : memref<16x32xf32, #tpu.memory_space<vmem>>, vector<16x32xf32>,
    } else {
    }
    %c0 = arith.constant 0 : index
    %c0_1 = arith.constant 0 : index
    %3 = vector.load %arg2[%c0, %c0_1] : memref<16x32xf32, #tpu.memory_space<vmem>>, vector<16x32xf32>
    %c0_2 = arith.constant 0 : index
    %c0_3 = arith.constant 0 : index
    %4 = vector.load %arg3[%c0_2, %c0_3] : memref<32x64xf32, #tpu.memory_space<vmem>>, vector<32x64xf32>
    %cst = arith.constant dense<0.000000e+00> : vector<16x64xf32>
    %5 = tpu.matmul %3, %4, %cst {dimension_numbers = #tpu.dot_dimension_numbers<[1], [0], [0], [1], [0, 0, 1, 1], [], []>} : vector<16x32xf32>, vector<32x64xf32>, vector<16x64xf32> -> vector<16x64xf32>
    %c0_4 = arith.constant 0 : index
    %c0_5 = arith.constant 0 : index
    %6 = vector.load %arg4[%c0_4, %c0_5] : memref<32x64xf32, #tpu.memory_space<vmem>>, vector<32x64xf32>
    %cst_6 = arith.constant dense<0.000000e+00> : vector<16x64xf32>
    %7 = tpu.matmul %3, %6, %cst_6 {dimension_numbers = #tpu.dot_dimension_numbers<[1], [0], [0], [1], [0, 0, 1, 1], [], []>} : vector<16x32xf32>, vector<32x64xf32>, vector<16x64xf32> -> vector<16x64xf32>
    %c0_7 = arith.constant 0 : index
    %c0_8 = arith.constant 0 : index
    %8 = vector.load %arg5[%c0_7, %c0_8] : memref<1x64xf32, #tpu.memory_space<vmem>>, vector<1x64xf32>
    %9 = vector.broadcast %8 : vector<1x64xf32> to vector<16x64xf32>
    %10 = arith.addf %5, %9 : vector<16x64xf32>
    %c0_9 = arith.constant 0 : index
    %c0_10 = arith.constant 0 : index
    %11 = vector.load %arg6[%c0_9, %c0_10] : memref<1x64xf32, #tpu.memory_space<vmem>>, vector<1x64xf32>
    %12 = vector.broadcast %11 : vector<1x64xf32> to vector<16x64xf32>
    %13 = arith.addf %7, %12 : vector<16x64xf32>
    %14 = arith.negf %10 : vector<16x64xf32>
    %15 = math.exp %14 : vector<16x64xf32>
    %cst_11 = arith.constant 1.000000e+00 : f32
    %16 = vector.broadcast %cst_11 : f32 to vector<16x64xf32>
    %17 = arith.addf %16, %15 : vector<16x64xf32>
    %18 = arith.divf %16, %17 : vector<16x64xf32>
    %19 = arith.mulf %10, %18 : vector<16x64xf32>
    %20 = arith.mulf %19, %13 : vector<16x64xf32>
    %c0_12 = arith.constant 0 : index
    %c0_13 = arith.constant 0 : index
    %21 = vector.load %arg10[%c0_12, %c0_13] : memref<16x32xf32, #tpu.memory_space<vmem>>, vector<16x32xf32>
    %c0_14 = arith.constant 0 : index
    %c0_15 = arith.constant 0 : index
    %22 = vector.load %arg7[%c0_14, %c0_15] : memref<64x32xf32, #tpu.memory_space<vmem>>, vector<64x32xf32>
    %cst_16 = arith.constant dense<0.000000e+00> : vector<16x32xf32>
    %23 = tpu.matmul %20, %22, %cst_16 {dimension_numbers = #tpu.dot_dimension_numbers<[1], [0], [0], [1], [0, 0, 1, 1], [], []>} : vector<16x64xf32>, vector<64x32xf32>, vector<16x32xf32> -> vector<16x32xf32>
    %24 = arith.addf %21, %23 : vector<16x32xf32>
    %c0_17 = arith.constant 0 : index
    %c0_18 = arith.constant 0 : index
    %25 = vector.load %arg10[%c0_17, %c0_18] : memref<16x32xf32, #tpu.memory_space<vmem>>, vector<16x32xf32>
    tpu.vector_store %arg10[%c0_17, %c0_18], %24 {strides = array<i32>} : memref<16x32xf32, #tpu.memory_space<vmem>>, vector<16x32xf32>,
    %c0_i32_19 = arith.constant 0 : i32
    %26 = arith.cmpi eq, %arg1, %c0_i32_19 : i32
    %27 = arith.extui %26 : i1 to i32
    %c0_i32_20 = arith.constant 0 : i32
    %28 = arith.cmpi ne, %27, %c0_i32_20 : i32
    scf.if %28 {
      %c0_21 = arith.constant 0 : index
      %c0_22 = arith.constant 0 : index
      %29 = vector.load %arg10[%c0_21, %c0_22] : memref<16x32xf32, #tpu.memory_space<vmem>>, vector<16x32xf32>
      %c0_23 = arith.constant 0 : index
      %c0_24 = arith.constant 0 : index
      %30 = vector.load %arg9[%c0_23, %c0_24] : memref<16x32xf32, #tpu.memory_space<vmem>>, vector<16x32xf32>
      tpu.vector_store %arg9[%c0_23, %c0_24], %29 {strides = array<i32>} : memref<16x32xf32, #tpu.memory_space<vmem>>, vector<16x32xf32>,
    } else {
    }
    return
  }
  func.func @transform_0(%arg0: i32, %arg1: i32) -> (i32, i32) {
    %c0_i32 = arith.constant 0 : i32
    %c0_i32_0 = arith.constant 0 : i32
    return %arg0, %c0_i32 : i32, i32
  }
  func.func @transform_1(%arg0: i32, %arg1: i32) -> (i32, i32) {
    %c0_i32 = arith.constant 0 : i32
    %c0_i32_0 = arith.constant 0 : i32
    return %c0_i32, %arg1 : i32, i32
  }
  func.func @transform_2(%arg0: i32, %arg1: i32) -> (i32, i32) {
    %c0_i32 = arith.constant 0 : i32
    %c0_i32_0 = arith.constant 0 : i32
    return %c0_i32, %arg1 : i32, i32
  }
  func.func @transform_3(%arg0: i32, %arg1: i32) -> (i32, i32) {
    %c0_i32 = arith.constant 0 : i32
    %c0_i32_0 = arith.constant 0 : i32
    return %c0_i32, %arg1 : i32, i32
  }
  func.func @transform_4(%arg0: i32, %arg1: i32) -> (i32, i32) {
    %c0_i32 = arith.constant 0 : i32
    %c0_i32_0 = arith.constant 0 : i32
    return %c0_i32, %arg1 : i32, i32
  }
  func.func @transform_5(%arg0: i32, %arg1: i32) -> (i32, i32) {
    %c0_i32 = arith.constant 0 : i32
    %c0_i32_0 = arith.constant 0 : i32
    return %arg1, %c0_i32 : i32, i32
  }
  func.func @transform_6(%arg0: i32, %arg1: i32) -> (i32, i32) {
    %c0_i32 = arith.constant 0 : i32
    %c0_i32_0 = arith.constant 0 : i32
    %c0_i32_1 = arith.constant 0 : i32
    return %c0_i32, %c0_i32_0 : i32, i32
  }
  func.func @transform_7(%arg0: i32, %arg1: i32) -> (i32, i32) {
    %c0_i32 = arith.constant 0 : i32
    %c0_i32_0 = arith.constant 0 : i32
    return %arg0, %c0_i32 : i32, i32
  }
}

</mosaic_0001>

<bundles_post_ra>
// kernel: tpu_custom_call.1
= control target key start
LH: loop header
LB: loop body
LE: loop exit
PB: predicated region body
PF: predicated region fallthrough
CT: control target
= control target key end

     0   :  { %vm38_vm0 = vcmask 261120   ;;  %s583_s0 = inlined_call_operand.vmem [shape: f32[16,32], index: 0, kind: input, shape index: {}]   ;;  %s584_s1 = inlined_call_operand.vmem [shape: f32[32,64], index: 1, kind: input, shape index: {}]   ;;  %s585_s2 = inlined_call_operand.vmem [shape: f32[32,64], index: 2, kind: input, shape index: {}]   ;;  %s586_s3 = inlined_call_operand.vmem [shape: f32[1,64], index: 3, kind: input, shape index: {}]   ;;  %s587_s4 = inlined_call_operand.vmem [shape: f32[1,64], index: 4, kind: input, shape index: {}]   ;;  %s588_s5 = inlined_call_operand.vmem [shape: f32[64,32], index: 5, kind: input, shape index: {}]   ;;  %s589_s6 = inlined_call_operand.vmem [shape: f32[1,32], index: 6, kind: input, shape index: {}]   ;;  %s590_s7 = inlined_call_operand.hbm [shape: f32[16,32], index: 7, kind: output, shape index: {}]  }
   0x1   :  { %v46_v0 = vld [vmem:[%s584_s1 + $0x18] sm:$0xff]  ;;  %v45_v1 = vld [vmem:[%s584_s1 + $0x10] sm:$0xff]  ;;  %v41_v2 = vld [vmem:[%s583_s0] sm:$0xff] }
   0x2   :  { %390 = vmatprep.subr.mxu1 %v46_v0  ;;  %v44_v3 = vld [vmem:[%s584_s1 + $0x8] sm:$0xff]  ;;  %398 = vmatprep.mubr.msk.f32.mxu1 %vm38_vm0, %v41_v2 }
   0x3   :  { %391 = vmatpush3.msra.mxu1 %v46_v0 }
   0x4   :  { %392 = vmatprep.subr.mxu1 %v45_v1 }
   0x5   :  { %12 = vsyncpa [#allocation4], 0  ;;  %393 = vmatpush3.msra.mxu1 %v45_v1  ;;  %v43_v4 = vld [vmem:[%s584_s1] sm:$0xff]  ;;  %v42_v5 = vld [vmem:[%s583_s0 + $0x8] sm:$0xff]  ;;  %vm248_vm1 = vcmask 523264  }
   0x6   :  { %394 = vmatprep.subr.mxu1 %v44_v3  ;;  %v50_v6 = vld [vmem:[%s585_s2 + $0x18] sm:$0xff]  ;;  %v49_v7 = vld [vmem:[%s585_s2 + $0x10] sm:$0xff]  ;;  %v48_v8 = vld [vmem:[%s585_s2 + $0x8] sm:$0xff] }
   0x7   :  { %395 = vmatpush3.msra.mxu1 %v44_v3  ;;  %v47_v9 = vld [vmem:[%s585_s2] sm:$0xff]  ;;  %v247_v10 = vld [vmem:[%s588_s5 + $0x38] sm:$0xff]  ;;  %v246_v11 = vld [vmem:[%s588_s5 + $0x30] sm:$0xff] }
   0x8   :  { %396 = vmatprep.subr.mxu1 %v43_v4  ;;  %412 = vmatprep.subr.mxu0 %v247_v10  ;;  %v245_v12 = vld [vmem:[%s588_s5 + $0x28] sm:$0xff]  ;;  %v244_v13 = vld [vmem:[%s588_s5 + $0x20] sm:$0xff]  ;;  %v243_v14 = vld [vmem:[%s588_s5 + $0x18] sm:$0xff] }
   0x9   :  { %397 = vmatpush3.msra.mxu1 %v43_v4  ;;  %413 = vmatpush3.msra.mxu0 %v247_v10  ;;  %v242_v15 = vld [vmem:[%s588_s5 + $0x10] sm:$0xff]  ;;  %v241_v16 = vld [vmem:[%s588_s5 + $0x8] sm:$0xff]  ;;  %v240_v17 = vld [vmem:[%s588_s5] sm:$0xff] }
   0xa   :  { %399 = vmatmul.mubr.msk.f32.vlgmr.msra.gmra.mxu1 %vm38_vm0, %v42_v5  ;;  %401 = vmatprep.subr.mxu1 %v50_v6  ;;  %v357_v18 = vld [vmem:[%s589_s6] ss:$0 sm:$0xff] }
   0xb   :  { %402 = vmatpush3.msra.mxu1 %v50_v6  ;;  %409 = vmatprep.mubr.msk.f32.mxu1 %vm38_vm0, %v41_v2  ;;  %40 = vst.msk [vmem:[#allocation2 + $0x8] sm:$0xff] %vm38_vm0, %v357_v18  ;;  %39 = vst.msk [vmem:[#allocation2] sm:$0xff] %vm38_vm0, %v357_v18  ;;  %v358_v19 = vld [vmem:[%s586_s3] ss:$0 sm:$0xff]  ;;  %s464_s3 = smov [#allocation3]  }
   0xc   :  { %403 = vmatprep.subr.mxu1 %v49_v7  ;;  %414 = vmatprep.subr.mxu0 %v246_v11  ;;  %v361_v31 = vld [vmem:[%s587_s4] ss:$0 sm:$0xff]  ;;  %s346_s4 = sshll.u32 %s464_s3, 4  ;;  %s347_s4 = int_to_ptr.vmem [resolvable:$true] %s346_s4 }
   0xd   :  { %404 = vmatpush3.msra.mxu1 %v49_v7  ;;  %415 = vmatpush3.msra.mxu0 %v246_v11  ;;  %s442_s15 = scalar_lea.vmem %s347_s4, 256  ;;  %p447_p1 = scmp.lt.s32.totalorder %s347_s4, %s347_s4 }
   0xe   :  { %405 = vmatprep.subr.mxu1 %v48_v8  ;;  %416 = vmatprep.subr.mxu0 %v245_v12  ;;  %p443_p0 = scmp.ne.s32.totalorder %s347_s4, %s442_s15  ;;  %p448_p2 = scmp.lt.s32.totalorder %s442_s15, %s442_s15 }
   0xf   :  { %406 = vmatpush3.msra.mxu1 %v48_v8  ;;  %417 = vmatpush3.msra.mxu0 %v245_v12 }
  0x10   :  { %407 = vmatprep.subr.mxu1 %v47_v9  ;;  %418 = vmatprep.subr.mxu0 %v244_v13  ;;  %p449_p3 = por %p448_p2, %p447_p1 }
  0x11   :  { %408 = vmatpush3.msra.mxu1 %v47_v9  ;;  %419 = vmatpush3.msra.mxu0 %v244_v13 }
  0x12   :  { %410 = vmatmul.mubr.msk.f32.vlgmr.msra.gmra.mxu1 %vm38_vm0, %v42_v5  ;;  %420 = vmatprep.subr.mxu0 %v243_v14  ;;  %v239_v41 = vld [vmem:[#allocation2 + $0x8] sm:$0xff]  ;;  %v238_v43 = vld [vmem:[#allocation2] sm:$0xff]  ;;  %p450_p4 = pnand %p449_p3, %p443_p0 }
  0x13   :  { %421 = vmatpush3.msra.mxu0 %v243_v14 }
  0x14   :  { %422 = vmatprep.subr.mxu0 %v242_v15 }
  0x15   :  { %423 = vmatpush3.msra.mxu0 %v242_v15 }
  0x16   :  { %424 = vmatprep.subr.mxu0 %v241_v16 }
  0x17   :  { %425 = vmatpush3.msra.mxu0 %v241_v16 }
  0x18   :  { %426 = vmatprep.subr.mxu0 %v240_v17 }
  0x19   :  { %427 = vmatpush3.msra.mxu0 %v240_v17 }
  0xca   :  { %v400_v20 = vpop.f32.mrf.mxu1 }
  0xcb   :  { %v137_v21 = vadd.f32 %v400_v20, %v358_v19 }
  0xcc   :  { %v131_v22 = vpop.f32.mrf.mxu1 }
  0xcd   :  { %v365_v23 = vmul.f32 -1.442695, %v137_v21  ;;  %v132_v24 = vadd.f32 %v358_v19, %v131_v22 }
  0xcf   :  { %434 = vpow2.f32 %v365_v23  ;;  %v364_v25 = vmul.f32 -1.442695, %v132_v24 }
  0xd1   :  { %436 = vpow2.f32 %v364_v25 }
  0xd2   :  { %v411_v30 = vpop.f32.mrf.mxu1 }
  0xd3   :  { %v219_v36 = vadd.f32 %v411_v30, %v361_v31 }
  0xd4   :  { %v213_v33 = vpop.f32.mrf.mxu1 }
  0xd5   :  { %v214_v38 = vadd.f32 %v361_v31, %v213_v33 }
  0xdc   :  { %v435_v26 = vpop.eup %434 }
  0xdd   :  { %v229_v27 = vadd.f32 1.0, %v435_v26 }
  0xde   :  { %v437_v28 = vpop.eup %436 }
  0xdf   :  { %438 = vrcp.f32 %v229_v27  ;;  %v228_v29 = vadd.f32 1.0, %v437_v28 }
  0xe1   :  { %440 = vrcp.f32 %v228_v29 }
  0xec   :  { %v439_v32 = vpop.eup %438 }
  0xed   :  { %v235_v35 = vmul.f32 %v439_v32, %v137_v21 }
  0xee   :  { %v441_v34 = vpop.eup %440 }
  0xef   :  { %v234_v37 = vmul.f32 %v441_v34, %v132_v24  ;;  %v237_v40 = vmul.f32 %v235_v35, %v219_v36 }
  0xf1   :  { %v236_v39 = vmul.f32 %v234_v37, %v214_v38 }
  0xf3   :  { %428 = vmatprep.mubr.msk.f32.mxu0 %vm248_vm1, %v236_v39 }
  0xf4   :  { %429 = vmatmul.mubr.msk.f32.vlgmr.msra.gmra.mxu0 %vm248_vm1, %v237_v40 }
 0x1b4   :  { %v430_v42 = vpop.f32.mrf.mxu0 }
 0x1b5   :  { %v331_v44 = vadd.f32 %v430_v42, %v239_v41 }
 0x1b6   :  { %v321_v45 = vpop.f32.mrf.mxu0 }
 0x1b7   :  { %333 = vst.msk [vmem:[#allocation2 + $0x8] sm:$0xff] %vm38_vm0, %v331_v44  ;;  %v330_v46 = vadd.f32 %v321_v45, %v238_v43 }
 0x1b9   :  { %332 = vst.msk [vmem:[#allocation2] sm:$0xff] %vm38_vm0, %v330_v46 }
 0x1be   :  { %v338_v47 = vld [vmem:[#allocation2 + $0x8] sm:$0xff] }
 0x1bf   :  { %340 = vst.msk [vmem:[#allocation3 + $0x8] sm:$0xff] %vm38_vm0, %v338_v47 }
 0x1c0   :  { %v337_v48 = vld [vmem:[#allocation2] sm:$0xff] }
 0x1c1   :  { %339 = vst.msk [vmem:[#allocation3] sm:$0xff] %vm38_vm0, %v337_v48 }
 0x1c2   :  { %453 = shalt.err (!%p450_p4)
}
 0x1c3   :  { %s465_s16 = smov 128   ;;  %s466_s1 = smov 8  }
 0x1c4   :  { %352 = dma.vmem_to_hbm [thread:$0]  %s347_s4, 256, %s590_s7, [#allocation4], %s465_s16, %s465_s16, %s466_s1  }
 0x1c5   :  { %462 = dma.done.wait [#allocation4], 256  }
 0x1c6   :  { %463 = vsyncadd [#allocation4], 4294967040 }
 0x1c7   :  { %356 = vsyncpa [#allocation4], 1 }

</bundles_post_ra>
